<compile_context>
chip_gen: v7x
topology: tpu7x:2x2x1
jax: 0.10.0
libtpu: 0.0.40
codegen_flags: <defaults>
</compile_context>

<pallas_src>
import jax
import jax.numpy as jnp
from jax.experimental import pallas as pl
from jax.experimental.pallas import tpu as pltpu


# ---------------------------------------------------------------------------
# Synthetic "vocab" for event types / role types (deterministic, in-script).
# ---------------------------------------------------------------------------
NUM_EVENT_TYPES = 5
NUM_ROLES = 16
ROLE_ALPHA = 0.3   # unused by forward(), kept for parity with __init__
ROLE_GAMMA = 2.0   # unused by forward(), kept for parity with __init__


def build_role_mask_table():
    """Deterministic stand-in for RoleMask._generate_mask().

    Returns a float32 table of shape (NUM_EVENT_TYPES, NUM_ROLES) containing
    only 0.0 / 1.0 — role r is "legal" for event type t iff (t + r) % 3 != 0.
    """
    t = jnp.arange(NUM_EVENT_TYPES)[:, None]
    r = jnp.arange(NUM_ROLES)[None, :]
    legal = ((t + r) % 3) != 0
    return legal.astype(jnp.float32)


# ---------------------------------------------------------------------------
# Pallas kernel: multiply a lane-dense (block_b, block_f) logits slab by the
# per-batch mask row, replicated in-kernel to the block width (VPU-only copy,
# free under the HBM-bound DMA pipeline).
# ---------------------------------------------------------------------------
def _role_mask_kernel(logits_ref, mask_ref, out_ref):
    reps = out_ref.shape[-1] // mask_ref.shape[-1]   # static at trace time
    m = mask_ref[...]
    if reps > 1:
        m = jnp.tile(m, (1, reps))
    out_ref[...] = logits_ref[...] * m


def _sublane_multiple(dtype):
    """Rows per fully packed vreg sublane group: 8 (f32), 16 (bf16), 32 (i8)."""
    return max(8, 32 // jnp.dtype(dtype).itemsize)


def _choose_blocks(bsz, flat, dtype, mask_width, *, target_bytes=4 << 20):
    """Pick (block_b, block_f) for the 2-D grid.

    Goals: ~target_bytes per double-buffered slab, lane-dense / phase-aligned
    lane blocks (multiples of the mask width, >= 1 vreg wide), legal
    sublane-multiple batch blocks, and >=2 total grid steps when achievable.
    """
    itemsize = jnp.dtype(dtype).itemsize
    sub = _sublane_multiple(dtype)

    # Lane-axis split unit: multiple of mask_width (role phase preserved) and
    # at least one vreg (128 lanes) wide when possible.
    f_unit = mask_width * max(1, pl.cdiv(128, mask_width))
    can_split_f = flat > f_unit

    # --- lane (flattened seq*roles) axis ---
    if can_split_f:
        cap = max(f_unit, ((target_bytes // (sub * itemsize)) // f_unit) * f_unit)
        block_f = min(flat, cap)
    else:
        block_f = flat

    # --- sublane (batch) axis ---
    rows = max(1, int(target_bytes // (block_f * itemsize)))
    if rows >= bsz:
        block_b = bsz                              # full dim -> always legal
    else:
        block_b = min(bsz, max(sub, (rows // sub) * sub))

    # --- guarantee >=2 grid steps when it can be done with legal blocks ---
    n_steps = pl.cdiv(bsz, block_b) * pl.cdiv(flat, block_f)
    if n_steps < 2:
        if bsz >= 2 * sub:
            block_b = max(sub, ((bsz // 2) // sub) * sub)
        elif can_split_f and flat >= 2 * f_unit:
            block_f = max(f_unit, ((flat // 2) // f_unit) * f_unit)
        # else: tiny problem; a single step is fine.

    return block_b, block_f


def role_mask_forward(logits, batch_event_types, mask_table, *,
                      block_b=None, block_f=None):
    """logits: (bsz, seq_l, num_roles) f32/bf16
       batch_event_types: (bsz,) int32 event-type ids
       mask_table: (num_event_types, num_roles) {0,1}
       returns (bsz, seq_l, num_roles), same dtype as logits
    """
    bsz, seq_l, num_roles = logits.shape
    flat = seq_l * num_roles
    dtype = logits.dtype

    # Lane-dense flattening (role index fastest): (b, s, r) -> (b, s*R + r).
    logits2d = logits.reshape(bsz, flat)

    # Tiny per-batch mask only (no logits-sized mask in HBM).  Widen to one
    # vreg (128 lanes) when roles divide 128 and flat is 128-aligned so the
    # in-kernel expansion is whole-vreg replication, not sub-lane shuffles.
    mask_rows = mask_table[batch_event_types].astype(dtype)           # (bsz, R)
    if (128 % num_roles == 0) and (flat % 128 == 0) and (num_roles < 128):
        mask_small = jnp.tile(mask_rows, (1, 128 // num_roles))       # (bsz, 128)
    else:
        mask_small = mask_rows                                        # (bsz, R)
    mask_width = mask_small.shape[1]

    if block_b is None or block_f is None:
        bb, bf = _choose_blocks(bsz, flat, dtype, mask_width)
        block_b = block_b if block_b is not None else bb
        block_f = block_f if block_f is not None else bf

    grid = (pl.cdiv(bsz, block_b), pl.cdiv(flat, block_f))

    data_spec = pl.BlockSpec((block_b, block_f), lambda i, j: (i, j))
    mask_spec = pl.BlockSpec((block_b, mask_width), lambda i, j: (i, 0))

    grid_spec = pltpu.PrefetchScalarGridSpec(
        num_scalar_prefetch=0,
        grid=grid,
        in_specs=[data_spec, mask_spec],
        out_specs=data_spec,
    )

    out2d = pl.pallas_call(
        _role_mask_kernel,
        out_shape=jax.ShapeDtypeStruct((bsz, flat), dtype),
        grid_spec=grid_spec,
        compiler_params=pltpu.CompilerParams(
            dimension_semantics=("parallel", "parallel"),  # both TCs on v7x
            vmem_limit_bytes=40 << 20,   # 2x(~4 MiB) logits + 2x(~4 MiB) out + tiny mask
        ),
    )(logits2d, mask_small)

    return out2d.reshape(bsz, seq_l, num_roles)


# ---------------------------------------------------------------------------
# Reference (pure JAX) for correctness check.
# ---------------------------------------------------------------------------
def role_mask_forward_ref(logits, batch_event_types, mask_table):
    mask = mask_table[batch_event_types].astype(logits.dtype)   # (bsz, num_roles)
    return logits * mask[:, None, :]


if __name__ == "__main__":
    key = jax.random.PRNGKey(0)
    bsz, seq_l = 2, 8

    k1, k2 = jax.random.split(key)
    logits = jax.random.uniform(k1, (bsz, seq_l, NUM_ROLES), dtype=jnp.float32)
    batch_event_types = jax.random.randint(
        k2, (bsz,), 0, NUM_EVENT_TYPES, dtype=jnp.int32)

    mask_table = build_role_mask_table()

    out = role_mask_forward(logits, batch_event_types, mask_table)
    out = jax.block_until_ready(out)

    ref = role_mask_forward_ref(logits, batch_event_types, mask_table)
    assert out.shape == (bsz, seq_l, NUM_ROLES)
    assert jnp.allclose(out, ref, atol=1e-6), "Pallas output mismatch vs reference"

    # TODO(synk): focal-loss / preference / weighted masks (non-forward helper
    # methods of RoleMask) are not part of forward() and are not implemented.
    print("KERNEL_OK")
</pallas_src>

<mosaic_0001>
module attributes {stable_mosaic.version = 11 : i64} {
  func.func @_role_mask_kernel(%arg0: i32, %arg1: i32, %arg2: memref<2x128xf32, #tpu.memory_space<vmem>>, %arg3: memref<2x128xf32, #tpu.memory_space<vmem>>, %arg4: memref<2x128xf32, #tpu.memory_space<vmem>>) attributes {dimension_semantics = [#tpu.dimension_semantics<parallel>, #tpu.dimension_semantics<parallel>], iteration_bounds = array<i64: 1, 1>, scalar_prefetch = 0 : i64, scratch_operands = 0 : i64, tpu.core_type = #tpu.core_type<tc>, window_params = [{transform_indices = @transform_0, window_bounds = array<i64: 2, 128>}, {transform_indices = @transform_1, window_bounds = array<i64: 2, 128>}, {transform_indices = @transform_2, window_bounds = array<i64: 2, 128>}]} {
    %c0 = arith.constant 0 : index
    %c0_0 = arith.constant 0 : index
    %0 = vector.load %arg3[%c0, %c0_0] : memref<2x128xf32, #tpu.memory_space<vmem>>, vector<2x128xf32>
    %c0_1 = arith.constant 0 : index
    %c0_2 = arith.constant 0 : index
    %1 = vector.load %arg2[%c0_1, %c0_2] : memref<2x128xf32, #tpu.memory_space<vmem>>, vector<2x128xf32>
    %2 = arith.mulf %1, %0 : vector<2x128xf32>
    %c0_3 = arith.constant 0 : index
    %c0_4 = arith.constant 0 : index
    %3 = vector.load %arg4[%c0_3, %c0_4] : memref<2x128xf32, #tpu.memory_space<vmem>>, vector<2x128xf32>
    tpu.vector_store %arg4[%c0_3, %c0_4], %2 {strides = array<i32>} : memref<2x128xf32, #tpu.memory_space<vmem>>, vector<2x128xf32>,
    return
  }
  func.func @transform_0(%arg0: i32, %arg1: i32) -> (i32, i32) {
    %c0_i32 = arith.constant 0 : i32
    return %arg0, %arg1 : i32, i32
  }
  func.func @transform_1(%arg0: i32, %arg1: i32) -> (i32, i32) {
    %c0_i32 = arith.constant 0 : i32
    %c0_i32_0 = arith.constant 0 : i32
    return %arg0, %c0_i32 : i32, i32
  }
  func.func @transform_2(%arg0: i32, %arg1: i32) -> (i32, i32) {
    %c0_i32 = arith.constant 0 : i32
    return %arg0, %arg1 : i32, i32
  }
}

</mosaic_0001>

<bundles_post_ra>
// kernel: tpu_custom_call.1
= control target key start
LH: loop header
LB: loop body
LE: loop exit
PB: predicated region body
PF: predicated region fallthrough
CT: control target
= control target key end

     0   :  { %7 = vsyncpa [#allocation3], 0  ;;  %s137_s0 = inlined_call_operand.hbm [shape: f32[2,128], index: 0, kind: input, shape index: {}]   ;;  %s138_s1 = inlined_call_operand.vmem [shape: f32[2,128], index: 1, kind: input, shape index: {}]   ;;  %s139_s2 = inlined_call_operand.hbm [shape: f32[2,128], index: 2, kind: output, shape index: {}]  }
   0x1   :  { %8 = vsyncpa [#allocation4], 0  ;;  %s93_s9 = smov [#allocation2]   ;;  %s45_s13 = scalar_lea.hbm %s137_s0, 32 }
   0x2   :  { %s15_s10 = sshll.u32 %s93_s9, 4  ;;  %p46_p0 = scmp.ne.s32.totalorder %s137_s0, %s45_s13  ;;  %s16_s10 = int_to_ptr.vmem [resolvable:$true] %s15_s10 }
   0x3   :  { %p49_p1 = scmp.lt.u32.totalorder %s45_s13, %s137_s0 }
   0x5   :  { %p51_p2 = pnand %p49_p1, %p46_p0 }
   0x7   :  { %54 = shalt.err (!%p51_p2)
}
   0x8   :  { %s55_s18 = scalar_lea.vmem %s16_s10, 32  ;;  %p60_p4 = scmp.lt.s32.totalorder %s16_s10, %s16_s10 }
   0x9   :  { %p56_p3 = scmp.ne.s32.totalorder %s16_s10, %s55_s18  ;;  %p61_p5 = scmp.lt.s32.totalorder %s55_s18, %s55_s18 }
   0xb   :  { %p62_p6 = por %p61_p5, %p60_p4 }
   0xd   :  { %p63_p7 = pnand %p62_p6, %p56_p3 }
   0xf   :  { %66 = shalt.err (!%p63_p7)
}
  0x10   :  { %18 = dma.hbm_to_vmem [thread:$0]  %s137_s0, 32, %s16_s10, [#allocation3]  }
  0x11   :  { %89 = dma.done.wait [#allocation3], 32  }
  0x12   :  { %90 = vsyncadd [#allocation3], 4294967264  ;;  %s94_s21 = smov [#allocation5]   ;;  %v24_v0 = vld [vmem:[%s138_s1] sm:$0x3] }
  0x13   :  { %s34_s22 = sshll.u32 %s94_s21, 4  ;;  %v25_v1 = vld [vmem:[#allocation2] sm:$0x3]  ;;  %s35_s22 = int_to_ptr.vmem [resolvable:$true] %s34_s22 }
  0x14   :  { %v26_v2 = vmul.f32 %v25_v1, %v24_v0  ;;  %s67_s25 = scalar_lea.vmem %s35_s22, 32  ;;  %p72_p9 = scmp.lt.s32.totalorder %s35_s22, %s35_s22 }
  0x15   :  { %p68_p8 = scmp.ne.s32.totalorder %s35_s22, %s67_s25  ;;  %p73_p10 = scmp.lt.s32.totalorder %s67_s25, %s67_s25 }
  0x16   :  { %27 = vst [vmem:[#allocation5] sm:$0x3] %v26_v2 }
  0x17   :  { %p74_p11 = por %p73_p10, %p72_p9 }
  0x19   :  { %p75_p12 = pnand %p74_p11, %p68_p8 }
  0x1b   :  { %78 = shalt.err (!%p75_p12)
}
  0x1c   :  { %s79_s27 = scalar_lea.hbm %s139_s2, 32 }
  0x1d   :  { %p80_p13 = scmp.ne.s32.totalorder %s139_s2, %s79_s27  ;;  %p83_p0 = scmp.lt.u32.totalorder %s79_s27, %s139_s2 }
  0x1f   :  { %p85_p1 = pnand %p83_p0, %p80_p13 }
  0x21   :  { %88 = shalt.err (!%p85_p1)
}
  0x22   :  { %37 = dma.vmem_to_hbm [thread:$0]  %s35_s22, 32, %s139_s2, [#allocation4]  }
  0x23   :  { %91 = dma.done.wait [#allocation4], 32  }
  0x24   :  { %92 = vsyncadd [#allocation4], 4294967264 }
  0x25   :  { %41 = vsyncpa [#allocation3], 1 }
  0x26   :  { %42 = vsyncpa [#allocation4], 1 }

</bundles_post_ra>
